<compile_context>
chip_gen: v7x
topology: tpu7x:2x2x1
jax: 0.10.0
libtpu: 0.0.40
codegen_flags: <defaults>
</compile_context>

<pallas_src>
import functools

import jax
import jax.numpy as jnp
from jax.experimental import pallas as pl
from jax.experimental.pallas import tpu as pltpu


def _round_up(x: int, m: int) -> int:
    return ((x + m - 1) // m) * m


def _bilinear_matrix(out_size: int, in_size: int) -> jnp.ndarray:
    """cv2-style (half-pixel) bilinear interpolation matrix of shape (out_size, in_size)."""
    scale = in_size / out_size
    dst = jnp.arange(out_size, dtype=jnp.float32)
    src = (dst + 0.5) * scale - 0.5
    src = jnp.clip(src, 0.0, in_size - 1)
    i0 = jnp.floor(src).astype(jnp.int32)
    i1 = jnp.minimum(i0 + 1, in_size - 1)
    w1 = src - i0.astype(jnp.float32)
    w0 = 1.0 - w1
    rows = jnp.arange(out_size)
    m = jnp.zeros((out_size, in_size), dtype=jnp.float32)
    m = m.at[rows, i0].add(w0)
    m = m.at[rows, i1].add(w1)
    return m


def _build_rwc(rw_eff: jnp.ndarray, C: int, s_pad: int) -> jnp.ndarray:
    """Width-interp matrix with channel de-interleave folded in.

    rw_eff: (S, W) width interpolation (flip already applied or not).
    Returns RWC of shape (W*C, C*s_pad) with RWC[w*C + c, c*s_pad + p] = rw_eff[p, w].
    """
    S, W = rw_eff.shape
    rwt = jnp.zeros((W, s_pad), jnp.float32).at[:, :S].set(rw_eff.T)       # (W, Spad)
    eye = jnp.eye(C, dtype=jnp.float32)
    return (rwt[:, None, None, :] * eye[None, :, :, None]).reshape(W * C, C * s_pad)


def _aug_kernel(C, s_pad, flip_ref, x_ref, rh_ref, rwc_ref, scale_ref, bias_ref, o_ref):
    del flip_ref  # only used in the BlockSpec index_maps (scalar prefetch)
    x2d = x_ref[0].astype(jnp.float32)                                  # (H, W*C)
    t = jnp.dot(rh_ref[...], x2d, preferred_element_type=jnp.float32)   # (S, W*C)
    out = jnp.dot(t, rwc_ref[0], preferred_element_type=jnp.float32)    # (S, C*Spad)
    out = out * scale_ref[...] + bias_ref[...]                          # lane-aligned fma
    # Channel column blocks are 128-aligned -> tile-aligned slices, lane-dense stores.
    for c in range(C):
        o_ref[0, c, :, :] = out[:, c * s_pad:(c + 1) * s_pad]


def train_augmentation(x, label, flip, *, image_size, image_mean, image_std):
    """Pallas implementation of TrainAugmentation.forward (batched).

    x:     (B, H, W, C) or (H, W, C) image(s), values in [0, 255] (albumentations convention).
    flip:  per-sample {0,1} HorizontalFlip decisions (runtime data, scalar-prefetched).
    Returns dict(image=(B, C, image_size, image_size) float32 [or unbatched], label=label).
    """
    squeeze = (x.ndim == 3)
    if squeeze:
        x = x[None]
        flip = jnp.reshape(jnp.asarray(flip), (1,))

    B, H, W, C = x.shape
    S = int(image_size)
    s_pad = _round_up(S, 128)     # lane-dense output width
    WC = W * C

    mean = jnp.asarray(image_mean, jnp.float32)
    std = jnp.asarray(image_std, jnp.float32)
    # Normalize (albumentations max_pixel_value=255): (p/255 - mean)/std == p*scale + bias.
    scale = 1.0 / (255.0 * std)                       # (C,)
    bias = -mean / std                                # (C,)
    scale_vec = jnp.repeat(scale, s_pad)[None, :]     # (1, C*Spad)
    bias_vec = jnp.repeat(bias, s_pad)[None, :]       # (1, C*Spad)

    rh = _bilinear_matrix(S, H)                       # (S, H)
    rw = _bilinear_matrix(S, W)                       # (S, W)
    rwc_stack = jnp.stack([_build_rwc(rw, C, s_pad),              # index 0: no flip
                           _build_rwc(rw[::-1, :], C, s_pad)])    # index 1: flipped

    # Contiguous trailing-dim merge: metadata-only reshape, no HBM transpose.
    x2d = x.reshape(B, H, WC)
    flip_flags = jnp.asarray(flip, jnp.int32).reshape(B)

    kernel = functools.partial(_aug_kernel, C, s_pad)
    out_padded = pl.pallas_call(
        kernel,
        out_shape=jax.ShapeDtypeStruct((B, C, S, s_pad), jnp.float32),
        grid_spec=pltpu.PrefetchScalarGridSpec(
            num_scalar_prefetch=1,
            grid=(B,),
            in_specs=[
                pl.BlockSpec((1, H, WC), lambda b, flips: (b, 0, 0)),          # image b (HWC view)
                pl.BlockSpec((S, H), lambda b, flips: (0, 0)),                 # Rh (resident)
                pl.BlockSpec((1, WC, C * s_pad),
                             lambda b, flips: (flips[b], 0, 0)),               # RWC[flip_b]
                pl.BlockSpec((1, C * s_pad), lambda b, flips: (0, 0)),         # scale_vec
                pl.BlockSpec((1, C * s_pad), lambda b, flips: (0, 0)),         # bias_vec
            ],
            out_specs=pl.BlockSpec((1, C, S, s_pad), lambda b, flips: (b, 0, 0, 0)),
        ),
        compiler_params=pltpu.CompilerParams(
            dimension_semantics=("parallel",),
            vmem_limit_bytes=48 * 1024 * 1024,
        ),
    )(flip_flags, x2d, rh, rwc_stack, scale_vec, bias_vec)

    image = out_padded[..., :S] if s_pad != S else out_padded
    if squeeze:
        image = image[0]
    # TODO(synk): albumentations' additional_targets={'label': 'label'} has no spatial semantics
    # for a plain class label; it is passed through unchanged here.
    return {"image": image, "label": label}


def _reference(x, flip_flags, image_size, image_mean, image_std):
    B, H, W, C = x.shape
    mean = jnp.asarray(image_mean, jnp.float32)
    std = jnp.asarray(image_std, jnp.float32)
    rh = _bilinear_matrix(image_size, H)
    rw = _bilinear_matrix(image_size, W)
    rw_f = rw[::-1, :]
    outs = []
    for b in range(B):
        rw_b = rw_f if bool(flip_flags[b]) else rw
        resized = jnp.einsum("oh,hwc,pw->cop", rh, x[b].astype(jnp.float32), rw_b)
        outs.append((resized / 255.0 - mean[:, None, None]) / std[:, None, None])
    return jnp.stack(outs)


if __name__ == "__main__":
    key = jax.random.PRNGKey(0)
    k_img, k_lab, k_flip = jax.random.split(key, 3)

    # Small shapes: batch of 2 RGB 16x16 images resized to 32x32.
    B, H, W, C = 2, 16, 16, 3
    IMAGE_SIZE = 32
    IMAGE_MEAN = (0.485, 0.456, 0.406)
    IMAGE_STD = (0.229, 0.224, 0.225)

    x = jax.random.uniform(k_img, (B, H, W, C), jnp.float32, 0.0, 255.0)
    labels = jax.random.randint(k_lab, (B,), 0, 10)
    # HorizontalFlip() p=0.5 per sample, as runtime data (no retrace per coin flip).
    flip_flags = jax.random.bernoulli(k_flip, 0.5, (B,)).astype(jnp.int32)

    result = train_augmentation(
        x, labels, flip_flags,
        image_size=IMAGE_SIZE, image_mean=IMAGE_MEAN, image_std=IMAGE_STD,
    )
    img = jax.block_until_ready(result["image"])

    ref = _reference(x, flip_flags, IMAGE_SIZE, IMAGE_MEAN, IMAGE_STD)
    assert img.shape == (B, C, IMAGE_SIZE, IMAGE_SIZE)
    assert jnp.allclose(img, ref, atol=1e-4, rtol=1e-4)

    print("KERNEL_OK")
</pallas_src>

<mosaic_0001>
module attributes {stable_mosaic.version = 11 : i64} {
  func.func @_aug_kernel(%arg0: i32, %arg1: memref<2xi32, #tpu.memory_space<smem>>, %arg2: memref<1x16x48xf32, #tpu.memory_space<vmem>>, %arg3: memref<32x16xf32, #tpu.memory_space<vmem>>, %arg4: memref<1x48x384xf32, #tpu.memory_space<vmem>>, %arg5: memref<1x384xf32, #tpu.memory_space<vmem>>, %arg6: memref<1x384xf32, #tpu.memory_space<vmem>>, %arg7: memref<1x3x32x128xf32, #tpu.memory_space<vmem>>) attributes {dimension_semantics = [#tpu.dimension_semantics<parallel>], iteration_bounds = array<i64: 2>, scalar_prefetch = 1 : i64, scratch_operands = 0 : i64, tpu.core_type = #tpu.core_type<tc>, window_params = [{transform_indices = @transform_0, window_bounds = array<i64: 1, 16, 48>}, {pipeline_mode = #tpu.pipeline_mode<synchronous>, transform_indices = @transform_1, window_bounds = array<i64: 32, 16>}, {transform_indices = @transform_2, window_bounds = array<i64: 1, 48, 384>}, {pipeline_mode = #tpu.pipeline_mode<synchronous>, transform_indices = @transform_3, window_bounds = array<i64: 1, 384>}, {pipeline_mode = #tpu.pipeline_mode<synchronous>, transform_indices = @transform_4, window_bounds = array<i64: 1, 384>}, {transform_indices = @transform_5, window_bounds = array<i64: 1, 3, 32, 128>}]} {
    %c0 = arith.constant 0 : index
    %c0_0 = arith.constant 0 : index
    %c0_1 = arith.constant 0 : index
    %0 = vector.load %arg2[%c0, %c0_0, %c0_1] : memref<1x16x48xf32, #tpu.memory_space<vmem>>, vector<1x16x48xf32>
    %1 = vector.shape_cast %0 : vector<1x16x48xf32> to vector<16x48xf32>
    %c0_2 = arith.constant 0 : index
    %c0_3 = arith.constant 0 : index
    %2 = vector.load %arg3[%c0_2, %c0_3] : memref<32x16xf32, #tpu.memory_space<vmem>>, vector<32x16xf32>
    %cst = arith.constant dense<0.000000e+00> : vector<32x48xf32>
    %3 = tpu.matmul %2, %1, %cst {dimension_numbers = #tpu.dot_dimension_numbers<[1], [0], [0], [1], [0, 0, 1, 1], [], []>} : vector<32x16xf32>, vector<16x48xf32>, vector<32x48xf32> -> vector<32x48xf32>
    %c0_4 = arith.constant 0 : index
    %c0_5 = arith.constant 0 : index
    %c0_6 = arith.constant 0 : index
    %4 = vector.load %arg4[%c0_4, %c0_5, %c0_6] : memref<1x48x384xf32, #tpu.memory_space<vmem>>, vector<1x48x384xf32>
    %5 = vector.shape_cast %4 : vector<1x48x384xf32> to vector<48x384xf32>
    %cst_7 = arith.constant dense<0.000000e+00> : vector<32x384xf32>
    %6 = tpu.matmul %3, %5, %cst_7 {dimension_numbers = #tpu.dot_dimension_numbers<[1], [0], [0], [1], [0, 0, 1, 1], [], []>} : vector<32x48xf32>, vector<48x384xf32>, vector<32x384xf32> -> vector<32x384xf32>
    %c0_8 = arith.constant 0 : index
    %c0_9 = arith.constant 0 : index
    %7 = vector.load %arg5[%c0_8, %c0_9] : memref<1x384xf32, #tpu.memory_space<vmem>>, vector<1x384xf32>
    %8 = vector.broadcast %7 : vector<1x384xf32> to vector<32x384xf32>
    %9 = arith.mulf %6, %8 : vector<32x384xf32>
    %c0_10 = arith.constant 0 : index
    %c0_11 = arith.constant 0 : index
    %10 = vector.load %arg6[%c0_10, %c0_11] : memref<1x384xf32, #tpu.memory_space<vmem>>, vector<1x384xf32>
    %11 = vector.broadcast %10 : vector<1x384xf32> to vector<32x384xf32>
    %12 = arith.addf %9, %11 : vector<32x384xf32>
    %13 = vector.extract_strided_slice %12 {offsets = [0, 0], sizes = [32, 128], strides = [1, 1]} : vector<32x384xf32> to vector<32x128xf32>
    %c0_12 = arith.constant 0 : index
    %c0_13 = arith.constant 0 : index
    %c0_14 = arith.constant 0 : index
    %c0_15 = arith.constant 0 : index
    %14 = vector.load %arg7[%c0_12, %c0_13, %c0_14, %c0_15] : memref<1x3x32x128xf32, #tpu.memory_space<vmem>>, vector<1x1x32x128xf32>
    %15 = vector.shape_cast %14 : vector<1x1x32x128xf32> to vector<32x128xf32>
    %16 = vector.shape_cast %13 : vector<32x128xf32> to vector<1x1x32x128xf32>
    tpu.vector_store %arg7[%c0_12, %c0_13, %c0_14, %c0_15], %16 {strides = array<i32>} : memref<1x3x32x128xf32, #tpu.memory_space<vmem>>, vector<1x1x32x128xf32>,
    %17 = vector.extract_strided_slice %12 {offsets = [0, 128], sizes = [32, 128], strides = [1, 1]} : vector<32x384xf32> to vector<32x128xf32>
    %c0_16 = arith.constant 0 : index
    %c1 = arith.constant 1 : index
    %c0_17 = arith.constant 0 : index
    %c0_18 = arith.constant 0 : index
    %18 = vector.load %arg7[%c0_16, %c1, %c0_17, %c0_18] : memref<1x3x32x128xf32, #tpu.memory_space<vmem>>, vector<1x1x32x128xf32>
    %19 = vector.shape_cast %18 : vector<1x1x32x128xf32> to vector<32x128xf32>
    %20 = vector.shape_cast %17 : vector<32x128xf32> to vector<1x1x32x128xf32>
    tpu.vector_store %arg7[%c0_16, %c1, %c0_17, %c0_18], %20 {strides = array<i32>} : memref<1x3x32x128xf32, #tpu.memory_space<vmem>>, vector<1x1x32x128xf32>,
    %21 = vector.extract_strided_slice %12 {offsets = [0, 256], sizes = [32, 128], strides = [1, 1]} : vector<32x384xf32> to vector<32x128xf32>
    %c0_19 = arith.constant 0 : index
    %c2 = arith.constant 2 : index
    %c0_20 = arith.constant 0 : index
    %c0_21 = arith.constant 0 : index
    %22 = vector.load %arg7[%c0_19, %c2, %c0_20, %c0_21] : memref<1x3x32x128xf32, #tpu.memory_space<vmem>>, vector<1x1x32x128xf32>
    %23 = vector.shape_cast %22 : vector<1x1x32x128xf32> to vector<32x128xf32>
    %24 = vector.shape_cast %21 : vector<32x128xf32> to vector<1x1x32x128xf32>
    tpu.vector_store %arg7[%c0_19, %c2, %c0_20, %c0_21], %24 {strides = array<i32>} : memref<1x3x32x128xf32, #tpu.memory_space<vmem>>, vector<1x1x32x128xf32>,
    return
  }
  func.func @transform_0(%arg0: i32, %arg1: memref<2xi32, #tpu.memory_space<smem>>) -> (i32, i32, i32) {
    %c0_i32 = arith.constant 0 : i32
    %c0_i32_0 = arith.constant 0 : i32
    %c0_i32_1 = arith.constant 0 : i32
    return %arg0, %c0_i32, %c0_i32_0 : i32, i32, i32
  }
  func.func @transform_1(%arg0: i32, %arg1: memref<2xi32, #tpu.memory_space<smem>>) -> (i32, i32) {
    %c0_i32 = arith.constant 0 : i32
    %c0_i32_0 = arith.constant 0 : i32
    %c0_i32_1 = arith.constant 0 : i32
    return %c0_i32, %c0_i32_0 : i32, i32
  }
  func.func @transform_2(%arg0: i32, %arg1: memref<2xi32, #tpu.memory_space<smem>>) -> (i32, i32, i32) {
    %0 = arith.index_cast %arg0 : i32 to index
    %1 = memref.load %arg1[%0] : memref<2xi32, #tpu.memory_space<smem>>
    %c0_i32 = arith.constant 0 : i32
    %c0_i32_0 = arith.constant 0 : i32
    %c0_i32_1 = arith.constant 0 : i32
    return %1, %c0_i32, %c0_i32_0 : i32, i32, i32
  }
  func.func @transform_3(%arg0: i32, %arg1: memref<2xi32, #tpu.memory_space<smem>>) -> (i32, i32) {
    %c0_i32 = arith.constant 0 : i32
    %c0_i32_0 = arith.constant 0 : i32
    %c0_i32_1 = arith.constant 0 : i32
    return %c0_i32, %c0_i32_0 : i32, i32
  }
  func.func @transform_4(%arg0: i32, %arg1: memref<2xi32, #tpu.memory_space<smem>>) -> (i32, i32) {
    %c0_i32 = arith.constant 0 : i32
    %c0_i32_0 = arith.constant 0 : i32
    %c0_i32_1 = arith.constant 0 : i32
    return %c0_i32, %c0_i32_0 : i32, i32
  }
  func.func @transform_5(%arg0: i32, %arg1: memref<2xi32, #tpu.memory_space<smem>>) -> (i32, i32, i32, i32) {
    %c0_i32 = arith.constant 0 : i32
    %c0_i32_0 = arith.constant 0 : i32
    %c0_i32_1 = arith.constant 0 : i32
    %c0_i32_2 = arith.constant 0 : i32
    return %arg0, %c0_i32, %c0_i32_0, %c0_i32_1 : i32, i32, i32, i32
  }
}

</mosaic_0001>

<bundles_post_ra>
// kernel: tpu_custom_call.1
= control target key start
LH: loop header
LB: loop body
LE: loop exit
PB: predicated region body
PF: predicated region fallthrough
CT: control target
= control target key end

     0   :  { %s1390_s0 = inlined_call_operand.vmem [shape: s32[2], index: 0, kind: input, shape index: {}]   ;;  %s1391_s1 = inlined_call_operand.vmem [shape: f32[2,16,48], index: 1, kind: input, shape index: {}]   ;;  %s1392_s2 = inlined_call_operand.vmem [shape: f32[32,16], index: 2, kind: input, shape index: {}]   ;;  %s1393_s3 = inlined_call_operand.hbm [shape: f32[2,48,384], index: 3, kind: input, shape index: {}]   ;;  %s1394_s4 = inlined_call_operand.vmem [shape: f32[1,384], index: 4, kind: input, shape index: {}]   ;;  %s1395_s5 = inlined_call_operand.vmem [shape: f32[1,384], index: 5, kind: input, shape index: {}]   ;;  %s1396_s6 = inlined_call_operand.hbm [shape: f32[2,3,32,128], index: 6, kind: output, shape index: {}]  }
   0x1   :  { %s11_s23 = sshll.u32 %s1390_s0, 4  ;;  %s12_s23 = int_to_ptr.vmem [resolvable:$true] %s11_s23 }
   0x2   :  { %s942_s24 = scalar_lea.vmem %s12_s23, 16  ;;  %p947_p1 = scmp.lt.s32.totalorder %s12_s23, %s12_s23 }
   0x3   :  { %p943_p0 = scmp.ne.s32.totalorder %s12_s23, %s942_s24  ;;  %p948_p2 = scmp.lt.s32.totalorder %s942_s24, %s942_s24 }
   0x5   :  { %p949_p3 = por %p948_p2, %p947_p1 }
   0x7   :  { %p950_p4 = pnand %p949_p3, %p943_p0 }
   0x9   :  { %953 = shalt.err (!%p950_p4)  }
   0xa   :  { %s1078_s25 = smov [#allocation3]  }
   0xb   :  { %14 = dma.vmem_to_smem %s12_s23, 16, %s1078_s25, [#allocation2] }
   0xc   :  { %1040 = dma.done.wait [#allocation2], 16 }
   0xd   :  { %1041 = vsyncadd [#allocation2], 4294967280 }
   0xe   :  { %16 = sfence }
   0xf   :  { %17 = vsyncpa [#allocation5], 0 }
  0x10   :  { %19 = vsyncpa [#allocation5 + $0x1], 0 }
  0x11   :  { %20 = vsyncpa [#allocation6], 0 }
  0x12   :  { %22 = vsyncpa [#allocation6 + $0x1], 0  ;;  %s1124_s26 = smov 0   ;;  %s1126_s0 = smov 0  }
  0x13   :  { %s1128_s27 = smov 0   ;;  %s1130_s28 = smov 0  }
  0x14   :  { %s1132_s29 = smov 0   ;;  %s1134_s30 = smov 0  }
  0x15   :  { %s1136_s7 = smov 0  }
  0x16 LB: > { %s1158_s8 = sadd.s32 4294967295, %s1076_s7   ;;  %s754_s9 = sadd.s32 4294967294, %s1076_s7   ;;  %s1076_s7 = sphi %s1136_s7, %s1417_s7   ;;  %s1072_s30 = sphi %s1134_s30, %s1416_s30   ;;  %s1068_s29 = sphi %s1132_s29, %s1415_s29   ;;  %s1064_s28 = sphi %s1130_s28, %s1414_s28   ;;  %s1060_s27 = sphi %s1128_s27, %s1413_s27   ;;  %s1056_s0 = sphi %s1126_s0, %s1412_s0   ;;  %s1052_s26 = sphi %s1124_s26, %s1411_s26  }
  0x17   : > { %s1162_s10 = sadd.s32 1, %s1076_s7   ;;  %s79_s11 = sld [smem:[#allocation3 + %s1076_s7]] }
  0x18   : > { %s80_s12 = sld [smem:[#allocation3 + %s1162_s10]]  ;;  %s84_s13 = sadd.s32 1, %s1072_s30 }
  0x19   : > { %p91_p5 = scmp.ne.s32.totalorder %s1072_s30, %s1068_s29  ;;  %p92_p6 = scmp.eq.s32.totalorder %s1076_s7, 0 }
  0x1a   : > { %p97_p7 = scmp.ne.s32.totalorder %s1068_s29, %s1064_s28  ;;  %p98_p8 = scmp.eq.s32.totalorder %s1158_s8, 0 }
  0x1b   : > { %p1172_p9 = por %p92_p6, %p91_p5  ;;  %s149_s15 = ssub.s32 %s1076_s7, %s1162_s10 }
  0x1c   : > { %p1178_p10 = por %p98_p8, %p97_p7  ;;  %p150_p11 = scmp.eq.s32.totalorder %s149_s15, 0 }
  0x1d   : > { %s152_s17 = sadd.s32 1, %s1060_s27  ;;  %p162_p12 = scmp.ne.s32.totalorder %s1060_s27, %s1056_s0 }
  0x1e   : > { %s1400_s16 = scalar_select %p1178_p10, 1, 0 }
  0x1f   : > { %s81_s18 = ssub.s32 %s79_s11, %s80_s12  ;;  %p163_p13 = scmp.eq.s32.totalorder %s1158_s8, 1 }
  0x20   : > { %p82_p0 = scmp.eq.s32.totalorder %s81_s18, 0  ;;  %p168_p1 = scmp.ne.s32.totalorder %s1056_s0, %s1052_s26 }
  0x21   : > { %s1189_s19 = scalar_select %p150_p11, %s1060_s27, %s152_s17  }
  0x22   : > { %s1192_s20 = scalar_select %p82_p0, %s1072_s30, %s84_s13  }
  0x23   : > { %p1194_p2 = por %p163_p13, %p162_p12  ;;  %p169_p3 = scmp.eq.s32.totalorder %s754_s9, 1 }
  0x24   : > { %1401 = sst [smem:[#allocation13_spill]] %s1192_s20  ;;  %s206_s23 = sand.u32 1, %s1072_s30  }
  0x25   : > { %s1402_s21 = scalar_select %p1194_p2, 1, 0 }
  0x26   : > { %p1199_p5 = por %p169_p3, %p168_p1  ;;  %p878_p6 = scmp.lt.s32.totalorder %s1076_s7, 2 }
  0x27   : > { %s857_s24 = smul.u32 144, %s206_s23  ;;  %p758_p8 = scmp.ge.s32.totalorder %s1076_s7, 1 }
  0x28   : > { %s1403_s22 = scalar_select %p1199_p5, 1, 0 }
  0x29   : > { %s862_s25 = scalar_select %p1172_p9, [#allocation3], [#allocation8] }
  0x2a   : > { %p1209_p7 = pnand %p878_p6, %p1172_p9  ;;  %s210_s12 = scalar_lea.vmem [#allocation4], %s857_s24 }
  0x2b   : > { %s863_s11 = scalar_select %p1172_p9, %s1076_s7, 0 }
  0x2c   : > { %s1419_s25 = smov (!%p878_p6, %s862_s25), [#allocation9]  ;;  %s218_s13 = sshll.u32 %s210_s12, 4  ;;  %s1222_s13 = int_to_ptr.vmem [resolvable:$true] %s218_s13 }
  0x2d   : > { %s1421_s11 = smov (!%p878_p6, %s863_s11), 0  ;;  %p226_p11 = scmp.lt.s32.totalorder %s1076_s7, 3 }
  0x2e   : > { %s211_s9 = sld [smem:[%s1419_s25 + %s1421_s11]]  ;;  %s1229_s24 = scalar_lea.sflag [#allocation5], %s206_s23 }
  0x2f   : > { %p1218_p12 = pnand %p758_p8, %p226_p11  ;;  %p956_p13 = pneg %p1209_p7 }
  0x30   : > { %s959_s20 = scalar_lea.hbm %s1393_s3, 4608 }
  0x34   : > { %s858_s17 = smul.u32 2304, %s211_s9 }
  0x36   : > { %s1227_s14 = scalar_lea.hbm %s1393_s3, %s858_s17 }
  0x37   : > { %s954_s25 = scalar_lea.hbm %s1227_s14, 2304  ;;  %p960_p3 = scmp.lt.u32.totalorder %s1227_s14, %s1393_s3 }
  0x38   : > { %p955_p9 = scmp.ne.s32.totalorder %s1227_s14, %s954_s25  ;;  %p961_p6 = scmp.lt.u32.totalorder %s959_s20, %s954_s25 }
  0x39   : > { %p963_p11 = scmp.lt.u32.totalorder %s954_s25, %s1227_s14 }
  0x3a   : > { %p957_p0 = pnand %p956_p13, %p955_p9  ;;  %p962_p8 = por %p961_p6, %p960_p3 }
  0x3c   : > { %p958_p1 = pneg %p957_p0  ;;  %p964_p4 = por %p963_p11, %p962_p8 }
  0x3e   : > { %p965_p5 = pnand %p964_p4, %p958_p1 }
  0x40   : > { %968 = shalt.err (!%p965_p5)
}
  0x41   : > { %s969_s23 = scalar_lea.vmem %s1222_s13, 2304  ;;  %s1079_s18 = smov [#allocation4]  }
  0x42   : > { %p970_p9 = scmp.ne.s32.totalorder %s1222_s13, %s969_s23  ;;  %s974_s11 = sshll.u32 %s1079_s18, 4  ;;  %s975_s11 = int_to_ptr.vmem [resolvable:$false] %s974_s11 }
  0x43   : > { %s976_s9 = scalar_lea.vmem %s975_s11, 4608  ;;  %p977_p10 = scmp.lt.s32.totalorder %s1222_s13, %s975_s11 }
  0x44   : > { %p972_p0 = pnand %p970_p9, %p956_p13  ;;  %p978_p3 = scmp.lt.s32.totalorder %s976_s9, %s969_s23 }
  0x46   : > { %p973_p2 = pneg %p972_p0  ;;  %p979_p6 = por %p978_p3, %p977_p10 }
  0x48   : > { %p980_p8 = pnand %p979_p6, %p973_p2 }
  0x4a   : > { %983 = shalt.err (!%p980_p8)
}
  0x4b   : > { %s1080_s25 = smov 384   ;;  %s1081_s20 = smov 24  }
  0x4c   : > { %873 = dma.hbm_to_vmem [thread:$0]  (!%p1209_p7), %s1227_s14, 2304, %s1222_s13, %s1229_s24, %s1080_s25, %s1080_s25, %s1081_s20  }
  0x4d   : > { %230 = sbr.rel (%p1218_p12) target bundleno = 555 (0x22b), region = 40  ;;  %s232_s12 = sand.u32 (!%p1218_p12), 1, %s1068_s29  }
  0x4e   : > { %s859_s17 = smul.u32 (!%p1218_p12), 144, %s232_s12  ;;  %s233_s18 = scalar_lea.sflag (!%p1218_p12), [#allocation5], %s232_s12 }
  0x4f   : > { %p1406_p10 = scmp.ne.s32.totalorder (!%p1218_p12), %s1400_s16, 0 }
  0x50   : > { %s1260_s23 = scalar_lea.vmem (!%p1218_p12), [#allocation4], %s859_s17 }
  0x54   : > { %1043 = dma.done.wait (%p1406_p10), %s233_s18, 2304  }
  0x55   : > { %1045 = vsyncadd (%p1406_p10), %s233_s18, 4294964992  ;;  %p268_p2 = scmp.lt.s32.totalorder %s1158_s8, 1  ;;  %vm280_vm0 = vcmask 130048   ;;  %v276_v2 = vld [vmem:[%s1392_s2] sm:$0xff]  ;;  %v277_v4 = vld [vmem:[%s1392_s2 + $0x8] sm:$0xff]  ;;  %v1082_v34 = vmov 0.0   ;;  %v585_v39 = vlaneseq }
  0x56   : > { %805 = vmatprep.mubr.msk.f32.mxu0 %vm280_vm0, %v276_v2  ;;  %v379_v5 = vld [vmem:[%s1260_s23 + $0x8] sm:$0xff]  ;;  %v382_v6 = vld [vmem:[%s1260_s23 + $0x20] sm:$0xff]  ;;  %v381_v10 = vld [vmem:[%s1260_s23 + $0x18] sm:$0xff]  ;;  %473 = vmatprep.mubr.f32.mxu1 %v1082_v34  ;;  %vm396_vm1 = vcmask 392192   ;;  %s861_s11 = smul.u32 1536, %s1158_s8  ;;  %p1407_p5 = scmp.ne.s32.totalorder %s1402_s21, 0 }
  0x57   : > { %s269_s28 = scalar_select %p268_p2, %s1158_s8, 1  ;;  %v378_v7 = vld [vmem:[%s1260_s23] sm:$0xff]  ;;  %v833_v9 = vpack.c.bf16 %v382_v6, %v379_v5  ;;  %v380_v11 = vld [vmem:[%s1260_s23 + $0x10] sm:$0xff]  ;;  %v383_v12 = vld [vmem:[%s1260_s23 + $0x28] sm:$0xff]  ;;  %v586_v40 = vshrl.u32 %v585_v39, 7 }
  0x58   : > { %v278_v8 = vld [vmem:[%s1392_s2 + $0x10] sm:$0xff]  ;;  %v835_v13 = vpack.c.bf16 %v381_v10, %v378_v7  ;;  %v845_v14 = vpack.c.bf16 %v383_v12, %v380_v11  ;;  %v385_v15 = vld [vmem:[%s1260_s23 + $0x38] sm:$0xff]  ;;  %v387_v19 = vld [vmem:[%s1260_s23 + $0x48] sm:$0xff]  ;;  %s1331_s12 = scalar_lea.hbm %s1396_s6, %s861_s11  ;;  %s1083_s18 = smov [#allocation7]  }
  0x59   : > { %s784_s13 = sshll.u32 %s269_s28, 4  ;;  %v388_v16 = vld [vmem:[%s1260_s23 + $0x50] sm:$0xff]  ;;  %834 = vmatprep.subr.bf16.mxu1 %v833_v9  ;;  %v386_v20 = vld [vmem:[%s1260_s23 + $0x40] sm:$0xff]  ;;  %v389_v21 = vld [vmem:[%s1260_s23 + $0x58] sm:$0xff]  ;;  %v587_v41 = vsub.s32 0, %v586_v40  ;;  %v591_v43 = vsub.s32 1, %v586_v40 }
  0x5a   : > { %s272_s24 = scalar_lea.vmem %s1391_s1, %s784_s13  ;;  %v384_v17 = vld [vmem:[%s1260_s23 + $0x30] sm:$0xff]  ;;  %v837_v18 = vpack.c.bf16 %v388_v16, %v385_v15  ;;  %836 = vmatpush1.bf16.msra.mxu1 %v835_v13  ;;  %v849_v23 = vpack.c.bf16 %v389_v21, %v386_v20  ;;  %v391_v24 = vld [vmem:[%s1260_s23 + $0x68] sm:$0xff]  ;;  %v394_v25 = vld [vmem:[%s1260_s23 + $0x80] sm:$0xff]  ;;  %v595_v44 = vsub.s32 2, %v586_v40  ;;  %s265_s13 = sand.u32 1, %s1056_s0  }
  0x5b   : > { %v274_v0 = vld [vmem:[%s272_s24] sm:$0xff]  ;;  %v275_v1 = vld [vmem:[%s272_s24 + $0x8] sm:$0xff]  ;;  %v839_v22 = vpack.c.bf16 %v387_v19, %v384_v17  ;;  %v841_v27 = vpack.c.bf16 %v394_v25, %v391_v24  ;;  %v279_v31 = vld [vmem:[%s1392_s2 + $0x18] sm:$0xff]  ;;  %s860_s24 = smul.u32 96, %s265_s13  ;;  %s1339_s8 = scalar_lea.sflag [#allocation6], %s265_s13 }
  0x5c   : > { %v829_v3 = vpack.c.bf16 %v275_v1, %v274_v0  ;;  %v390_v26 = vld [vmem:[%s1260_s23 + $0x60] sm:$0xff]  ;;  %838 = vmatprep.subr.bf16.mxu1 %v837_v18  ;;  %v393_v28 = vld [vmem:[%s1260_s23 + $0x78] sm:$0xff]  ;;  %v392_v29 = vld [vmem:[%s1260_s23 + $0x70] sm:$0xff] }
  0x5d   : > { %v395_v30 = vld [vmem:[%s1260_s23 + $0x88] sm:$0xff]  ;;  %v843_v33 = vpack.c.bf16 %v393_v28, %v390_v26  ;;  %v583_v42 = vld [vmem:[%s1394_s4] sm:$0x7]  ;;  %s1314_s16 = scalar_lea.vmem [#allocation7], %s860_s24  ;;  %s988_s23 = sshll.u32 %s1083_s18, 4  ;;  %s989_s23 = int_to_ptr.vmem [resolvable:$false] %s988_s23 }
  0x5e   : > { %830 = vmatprep.subr.bf16.mxu0 %v829_v3  ;;  %v853_v32 = vpack.c.bf16 %v395_v30, %v392_v29  ;;  %840 = vmatpush1.bf16.msra.mxu1 %v839_v22  ;;  %v612_v45 = vld [vmem:[%s1395_s5] sm:$0x7]  ;;  %v588_v46 = vrot.slane %v583_v42, %v587_v41  ;;  %v592_v47 = vrot.slane %v583_v42, %v591_v43  ;;  %s669_s9 = sshll.u32 %s1314_s16, 4  ;;  %s990_s28 = scalar_lea.vmem %s989_s23, 3072  ;;  %s1333_s9 = int_to_ptr.vmem [resolvable:$true] %s669_s9 }
  0x5f   : > { %832 = vmatpush3.bf16.msra.mxu0 %v829_v3  ;;  %842 = vmatprep.subr.bf16.mxu1 %v841_v27  ;;  %v596_v48 = vrot.slane %v583_v42, %v595_v44  ;;  %v617_v49 = vrot.slane %v612_v45, %v587_v41  ;;  %v621_v51 = vrot.slane %v612_v45, %v591_v43  ;;  %s984_s17 = scalar_lea.vmem %s1333_s9, 1536  ;;  %p991_p13 = scmp.lt.s32.totalorder %s1333_s9, %s989_s23 }
  0x60   : > { %846 = vmatprep.subr.bf16.mxu0 %v845_v14  ;;  %v625_v52 = vrot.slane %v612_v45, %v595_v44  ;;  %p985_p4 = scmp.ne.s32.totalorder %s1333_s9, %s984_s17  ;;  %p992_p1 = scmp.lt.s32.totalorder %s990_s28, %s984_s17 }
  0x62   : > { %806 = vmatmul.mubr.msk.f32.vlgmr.msra.gmra.mrb[0].mxu0 %vm280_vm0, %v277_v4  ;;  %844 = vmatpush1.bf16.msra.mxu1 %v843_v33  ;;  %p986_p7 = pnand %p985_p4, %p1407_p5  ;;  %p993_p11 = por %p992_p1, %p991_p13 }
  0x63   : > { %808 = vmatprep.mubr.msk.f32.mxu0 %vm280_vm0, %v278_v8  ;;  %848 = vmatpush3.bf16.msra.mxu0 %v845_v14 }
  0x64   : > { %850 = vmatprep.subr.bf16.mxu0 %v849_v23  ;;  %p987_p12 = pneg %p986_p7 }
  0x66   : > { %809 = vmatmul.mubr.msk.f32.gmra.mrb[2].mxu0 %vm280_vm0, %v279_v31  ;;  %p994_p9 = pnand %p993_p11, %p987_p12 }
  0x67   : > { %852 = vmatpush3.bf16.msra.mxu0 %v849_v23 }
  0x68   : > { %854 = vmatprep.subr.bf16.mxu0 %v853_v32 }
  0x6b   : > { %856 = vmatpush3.bf16.msra.mxu0 %v853_v32 }
 0x135   : > { %v807_v35 = vpop.f32.mrb[0].mxu0 }
 0x136   : > { %v359_v36 = vpop.f32.mrb[1].mxu0 }
 0x137   : > { %765 = vmatmul.mubr.msk.f32.vlgmr.msra.gmra.mrb[0].mxu1 %vm396_vm1, %v359_v36  ;;  %823 = vmatprep.mubr.msk.f32.mxu0 %vm396_vm1, %v359_v36 }
 0x138   : > { %824 = vmatmul.mubr.msk.f32.vlgmr.msra.gmra.mrb[4].mxu0 %vm396_vm1, %v807_v35  ;;  %479 = vmatprep.mubr.f32.mxu1 %v1082_v34 }
 0x139   : > { %v810_v37 = vpop.f32.mrb[2].mxu0 }
 0x13a   : > { %v369_v38 = vpop.f32.mrb[3].mxu0 }
 0x13b   : > { %766 = vmatmul.mubr.msk.f32.gmra.mrb[2].mxu1 %vm396_vm1, %v807_v35  ;;  %826 = vmatprep.mubr.msk.f32.mxu0 %vm396_vm1, %v369_v38 }
 0x13c   : > { %827 = vmatmul.mubr.msk.f32.gmra.mrb[6].mxu0 %vm396_vm1, %v810_v37  ;;  %485 = vmatprep.mubr.f32.mxu1 %v1082_v34 }
 0x13f   : > { %767 = vmatmul.mubr.msk.f32.gmra.mrb[4].mxu1 %vm396_vm1, %v369_v38 }
 0x140   : > { %491 = vmatprep.mubr.f32.mxu1 %v1082_v34 }
 0x143   : > { %768 = vmatmul.mubr.msk.f32.gmra.mrb[6].mxu1 %vm396_vm1, %v810_v37 }
 0x20a   : > { %v475_v50 = vpop.f32.mrb[0].mxu1 }
 0x20b   : > { %v600_v53 = vmul.f32 %v588_v46, %v475_v50  ;;  %v477_v54 = vpop.f32.mrb[1].mxu1  ;;  %v825_v55 = vpop.f32.mrb[4].mxu0 }
 0x20c   : > { %v601_v56 = vmul.f32 %v592_v47, %v477_v54  ;;  %v605_v57 = vmul.f32 %v825_v55, %v596_v48  ;;  %v564_v58 = vpop.f32.mrb[5].mxu0 }
 0x20d   : > { %v629_v59 = vadd.f32 %v617_v49, %v600_v53  ;;  %v602_v60 = vmul.f32 %v596_v48, %v564_v58 }
 0x20e   : > { %v630_v61 = vadd.f32 %v621_v51, %v601_v56  ;;  %v634_v62 = vadd.f32 %v625_v52, %v605_v57  ;;  %v481_v63 = vpop.f32.mrb[2].mxu1 }
 0x20f   : > { %641 = vst [vmem:[%s1314_s16] sm:$0xff] %v629_v59  ;;  %v631_v0 = vadd.f32 %v625_v52, %v602_v60  ;;  %v603_v1 = vmul.f32 %v588_v46, %v481_v63  ;;  %v483_v2 = vpop.f32.mrb[3].mxu1  ;;  %v828_v3 = vpop.f32.mrb[6].mxu0 }
 0x210   : > { %773 = vst [vmem:[%s1314_s16 + $0x20] sm:$0xff] %v630_v61  ;;  %778 = vst [vmem:[%s1314_s16 + $0x48] sm:$0xff] %v634_v62  ;;  %v604_v4 = vmul.f32 %v592_v47, %v483_v2  ;;  %v611_v5 = vmul.f32 %v828_v3, %v596_v48  ;;  %v574_v6 = vpop.f32.mrb[7].mxu0 }
 0x211   : > { %777 = vst [vmem:[%s1314_s16 + $0x40] sm:$0xff] %v631_v0  ;;  %v632_v7 = vadd.f32 %v617_v49, %v603_v1  ;;  %v608_v8 = vmul.f32 %v596_v48, %v574_v6 }
 0x212   : > { %v633_v9 = vadd.f32 %v621_v51, %v604_v4  ;;  %v640_v10 = vadd.f32 %v625_v52, %v611_v5  ;;  %v487_v11 = vpop.f32.mrb[4].mxu1 }
 0x213   : > { %642 = vst [vmem:[%s1314_s16 + $0x8] sm:$0xff] %v632_v7  ;;  %v637_v12 = vadd.f32 %v625_v52, %v608_v8  ;;  %v606_v13 = vmul.f32 %v588_v46, %v487_v11  ;;  %v489_v14 = vpop.f32.mrb[5].mxu1 }
 0x214   : > { %774 = vst [vmem:[%s1314_s16 + $0x28] sm:$0xff] %v633_v9  ;;  %780 = vst [vmem:[%s1314_s16 + $0x58] sm:$0xff] %v640_v10  ;;  %v607_v15 = vmul.f32 %v592_v47, %v489_v14 }
 0x215   : > { %779 = vst [vmem:[%s1314_s16 + $0x50] sm:$0xff] %v637_v12  ;;  %v635_v16 = vadd.f32 %v617_v49, %v606_v13 }
 0x216   : > { %v636_v17 = vadd.f32 %v621_v51, %v607_v15  ;;  %v493_v18 = vpop.f32.mrb[6].mxu1 }
 0x217   : > { %643 = vst [vmem:[%s1314_s16 + $0x10] sm:$0xff] %v635_v16  ;;  %v609_v19 = vmul.f32 %v588_v46, %v493_v18  ;;  %v495_v20 = vpop.f32.mrb[7].mxu1 }
 0x218   : > { %775 = vst [vmem:[%s1314_s16 + $0x30] sm:$0xff] %v636_v17  ;;  %v610_v21 = vmul.f32 %v592_v47, %v495_v20 }
 0x219   : > { %v638_v22 = vadd.f32 %v617_v49, %v609_v19 }
 0x21a   : > { %v639_v23 = vadd.f32 %v621_v51, %v610_v21 }
 0x21b   : > { %644 = vst [vmem:[%s1314_s16 + $0x18] sm:$0xff] %v638_v22 }
 0x21c   : > { %776 = vst [vmem:[%s1314_s16 + $0x38] sm:$0xff] %v639_v23 }
 0x21d   : > { %997 = shalt.err (!%p994_p9)
}
 0x21e   : > { %s998_s13 = scalar_lea.hbm %s1331_s12, 1536  ;;  %s1002_s24 = scalar_lea.hbm %s1396_s6, 3072 }
 0x21f   : > { %p999_p0 = scmp.ne.s32.totalorder %s1331_s12, %s998_s13  ;;  %p1003_p8 = scmp.lt.u32.totalorder %s1331_s12, %s1396_s6 }
 0x220   : > { %p1004_p10 = scmp.lt.u32.totalorder %s1002_s24, %s998_s13  ;;  %p1006_p4 = scmp.lt.u32.totalorder %s998_s13, %s1331_s12 }
 0x221   : > { %p1000_p3 = pnand %p999_p0, %p1407_p5 }
 0x222   : > { %p1005_p2 = por %p1004_p10, %p1003_p8 }
 0x223   : > { %p1001_p6 = pneg %p1000_p3 }
 0x224   : > { %p1007_p7 = por %p1006_p4, %p1005_p2 }
 0x226   : > { %p1008_p12 = pnand %p1007_p7, %p1001_p6 }
 0x228   : > { %1011 = shalt.err (!%p1008_p12)
}
 0x229   : > { %s1084_s25 = smov 128   ;;  %s1085_s20 = smov 8  }
 0x22a   : > { %866 = dma.vmem_to_hbm [thread:$0]  (%p1407_p5), %s1333_s9, 1536, %s1331_s12, %s1339_s8, %s1084_s25, %s1084_s25, %s1085_s20  }
 0x22b PF: > { %s684_s17 = sand.u32 1, %s1052_s26   ;;  %p1408_p13 = scmp.ne.s32.totalorder %s1403_s22, 0 }
 0x22c   : > { %p1409_p1 = scmp.ge.s32.totalorder %s1076_s7, 2  ;;  %s685_s18 = scalar_lea.sflag [#allocation6], %s684_s17 }
 0x22e   : > { %p875_p11 = pnand %p1409_p1, %p1408_p13 }
 0x230   : > { %1047 = dma.done.wait (!%p875_p11), %s685_s18, 1536  }
 0x231   : > { %1049 = vsyncadd (!%p875_p11), %s685_s18, 4294965760  ;;  %s1410_s23 = sld [smem:[#allocation13_spill]]  ;;  %p25_p5 = scmp.ge.s32.totalorder %s1162_s10, 4  }
 0x232   : > { %s1411_s26 = smov %s1056_s0  ;;  %s1412_s0 = smov %s1060_s27 }
 0x233   : > { %s1413_s27 = smov %s1189_s19  ;;  %s1414_s28 = smov %s1068_s29 }
 0x234   : > { %s1415_s29 = smov %s1072_s30  ;;  %s1417_s7 = smov %s1162_s10 }
 0x235   :  { %27 = sbr.rel (!%p25_p5) target bundleno = 22 (0x16), region = 90 }
 0x237   : > { %s1416_s30 = smov %s1410_s23 }
 0x23c   :  { %690 = vsyncpa [#allocation5], 1 }
 0x23d   :  { %692 = vsyncpa [#allocation5 + $0x1], 1 }
 0x23e   :  { %693 = vsyncpa [#allocation6], 1 }
 0x23f   :  { %695 = vsyncpa [#allocation6 + $0x1], 1 }

</bundles_post_ra>
